<compile_context>
chip_gen: v7x
topology: tpu7x:2x2x1
jax: 0.10.0
libtpu: 0.0.40
codegen_flags: <defaults>
</compile_context>

<pallas_src>
import functools

import jax
import jax.numpy as jnp
from jax import lax
from jax.experimental import pallas as pl
from jax.experimental.pallas import tpu as pltpu


def _ppo_loss_kernel(*refs, clip_epsilon, clip_value, norm_adv,
                     n_rows, tile_rows, tiles_per_core, needs_mask):
    refs = list(refs)
    out_ref = refs.pop()                     # (6, 8, 128) per-core partial sums
    idx = 0
    stat_ref = None
    if norm_adv:
        stat_ref = refs[0]                   # SMEM (2,): [adv_mean, 1/(std+1e-8)]
        idx = 1
    lp_ref, val_ref, adv_ref, ret_ref, nlp_ref, ent_ref = refs[idx:idx + 6]
    nval_ref = refs[idx + 6] if clip_value else None

    c = pl.program_id(0)                     # TensorCore axis ("parallel")
    i = pl.program_id(1)                     # tile axis ("arbitrary", streaming)
    t = c * tiles_per_core + i               # global tile index

    @pl.when(i == 0)
    def _():
        out_ref[...] = jnp.zeros_like(out_ref)

    def accumulate(mask):
        def acc(j, x):
            if mask is not None:
                x = jnp.where(mask, x, 0.0)          # select (not multiply): safe vs NaN/Inf garbage
            # (tile_rows, 128) -> (8, 128): pure VPU adds, cross-lane work deferred to wrapper.
            out_ref[j] += jnp.sum(x.reshape(tile_rows // 8, 8, 128), axis=0)

        logratio = nlp_ref[...].astype(jnp.float32) - lp_ref[...].astype(jnp.float32)
        ratio = jnp.exp(logratio)
        acc(0, logratio)                                             # sum(logratio)
        acc(1, ratio - 1.0 - logratio)                               # sum for approx_kl
        acc(2, (jnp.abs(ratio - 1.0) > clip_epsilon).astype(jnp.float32))

        adv = adv_ref[...].astype(jnp.float32)
        if norm_adv:
            adv = (adv - stat_ref[0]) * stat_ref[1]
        pg = jnp.maximum(
            -adv * ratio,
            -adv * jnp.clip(ratio, 1.0 - clip_epsilon, 1.0 + clip_epsilon))
        acc(3, pg)

        values = val_ref[...].astype(jnp.float32)
        returns = ret_ref[...].astype(jnp.float32)
        if clip_value:
            v_unc = (values - returns) ** 2
            v_cl = values + jnp.clip(nval_ref[...].astype(jnp.float32) - values,
                                     -clip_epsilon, clip_epsilon)
            v_err = jnp.maximum(v_unc, (v_cl - returns) ** 2)
        else:
            # matches the reference exactly: uses `values`, not `new_values`.
            v_err = (values - returns) ** 2
        acc(4, v_err)
        acc(5, ent_ref[...].astype(jnp.float32))

    if not needs_mask:
        accumulate(None)
    else:
        full_cut = n_rows // tile_rows       # first tile that straddles / passes the end

        @pl.when(t < full_cut)
        def _():                              # fast path: no iota / compare / selects
            accumulate(None)

        @pl.when(t >= full_cut)
        def _():                              # only the trailing (possibly empty) tiles
            rid = lax.broadcasted_iota(jnp.int32, (tile_rows, 128), 0)
            valid = (rid + t * tile_rows) < n_rows
            accumulate(valid)


def _round_up(x, m):
    return (x + m - 1) // m * m


def _device_config():
    """Generation-specific (tile_rows, vmem_limit_bytes, num_tensorcores)."""
    kind = jax.devices()[0].device_kind.lower()
    if "v5 lite" in kind or "v5e" in kind or "v5litepod" in kind:
        return 1024, 48 * 1024 * 1024, 1      # v5e: HBM-bound, 1024 rows ~86% roofline
    if "v6" in kind or "trillium" in kind:
        return 2048, 64 * 1024 * 1024, 1      # v6e: 128 MiB physical VMEM
    if "v7" in kind or "7x" in kind:
        return 1024, 40 * 1024 * 1024, 2      # v7x: 64 MiB VMEM, 2 TensorCores
    if "v4" in kind or "v5p" in kind or "v5" in kind:
        return 512, None, 2                   # megacore: 2 cores, small scoped VMEM
    return 512, None, 1                       # unknown / older generations


def clip_ppo_loss(logprobs, values, advantages, returns, new_logprobs,
                  new_entropies, new_values=None, *, clip_epsilon=0.2,
                  clip_value=False, value_coef=0.5, entropy_coef=0.01,
                  norm_adv=True):
    """Pallas TPU implementation of ClipPPOLoss.forward."""
    n = int(logprobs.size)
    assert n % 128 == 0, "kernel assumes N divisible by 128 (TPU lane width)"
    n_rows = n // 128

    target_rows, vmem_limit, num_cores = _device_config()
    tile_rows = min(target_rows, _round_up(n_rows, 8))
    n_tiles = pl.cdiv(n_rows, tile_rows)
    tiles_per_core = pl.cdiv(n_tiles, num_cores)
    needs_mask = (num_cores * tiles_per_core * tile_rows) != n_rows
    shape2d = (n_rows, 128)

    inputs = [logprobs, values, advantages, returns, new_logprobs, new_entropies]
    if clip_value:
        assert new_values is not None
        inputs.append(new_values)              # only DMA'd when it is actually read
    # Stream native dtype (bf16 stays bf16); kernel upcasts per tile.
    args = [jnp.asarray(a).reshape(shape2d) for a in inputs]

    extra_args, extra_specs = [], []
    if norm_adv:
        # One fused pass over advantages (sum + sum of squares) in the wrapper; the
        # kernel becomes single-phase and reads advantages only once more.
        adv32 = jnp.asarray(advantages, jnp.float32).reshape(-1)
        s = jnp.sum(adv32)
        ss = jnp.sum(adv32 * adv32)
        mean = s / n
        var = jnp.maximum(ss - s * mean, 0.0) / max(n - 1, 1)   # unbiased (ddof=1)
        inv_std = 1.0 / (jnp.sqrt(var) + jnp.float32(1e-8))
        extra_args.append(jnp.stack([mean, inv_std]))
        extra_specs.append(pl.BlockSpec(memory_space=pltpu.MemorySpace.SMEM))

    def tile_map(c, i):
        t = c * tiles_per_core + i
        return (jnp.minimum(t, n_tiles - 1), 0)   # clamp: padded tiles re-read last block

    in_specs = extra_specs + [pl.BlockSpec((tile_rows, 128), tile_map) for _ in args]

    kernel = functools.partial(
        _ppo_loss_kernel,
        clip_epsilon=float(clip_epsilon), clip_value=bool(clip_value),
        norm_adv=bool(norm_adv), n_rows=n_rows, tile_rows=tile_rows,
        tiles_per_core=tiles_per_core, needs_mask=bool(needs_mask))

    cp_kwargs = dict(dimension_semantics=("parallel", "arbitrary"))
    if vmem_limit is not None:
        cp_kwargs["vmem_limit_bytes"] = int(vmem_limit)

    bytes_in = sum(int(a.size) * a.dtype.itemsize for a in args)
    cost = pl.CostEstimate(flops=30 * n, transcendentals=n,
                           bytes_accessed=bytes_in + num_cores * 6 * 8 * 128 * 4)

    partials = pl.pallas_call(
        kernel,
        out_shape=jax.ShapeDtypeStruct((num_cores, 6, 8, 128), jnp.float32),
        grid=(num_cores, tiles_per_core),
        in_specs=in_specs,
        out_specs=pl.BlockSpec((None, 6, 8, 128), lambda c, i: (c, 0, 0, 0)),
        compiler_params=pltpu.CompilerParams(**cp_kwargs),
        cost_estimate=cost,
    )(*extra_args, *args)

    # Tiny finalize in the wrapper: combine per-core lane-vector partial sums.
    sums = jnp.sum(partials, axis=(0, 2, 3))          # (6,)
    inv_n = jnp.float32(1.0 / n)
    old_approx_kl = -sums[0] * inv_n
    approx_kl = sums[1] * inv_n
    frac_clipped = sums[2] * inv_n
    pg_loss = sums[3] * inv_n
    v_loss = 0.5 * sums[4] * inv_n
    entropy_bonus = sums[5] * inv_n
    loss = (pg_loss + jnp.float32(value_coef) * v_loss
            - jnp.float32(entropy_coef) * entropy_bonus)
    stats = {"old_approx_kl": old_approx_kl,
             "approx_kl": approx_kl,
             "fraction_clipped": frac_clipped}
    return loss, stats


def _reference(logprobs, values, advantages, returns, new_logprobs,
               new_entropies, new_values, *, clip_epsilon=0.2,
               clip_value=False, value_coef=0.5, entropy_coef=0.01,
               norm_adv=True):
    """Pure-JAX mirror of the PyTorch forward, for verification."""
    logratio = new_logprobs - logprobs
    ratio = jnp.exp(logratio)
    old_approx_kl = jnp.mean(-logratio)
    approx_kl = jnp.mean(ratio - 1.0 - logratio)
    frac_clipped = jnp.mean(
        (jnp.abs(ratio - 1.0) > clip_epsilon).astype(jnp.float32))
    adv = advantages
    if norm_adv:
        adv = (adv - jnp.mean(adv)) / (jnp.std(adv, ddof=1) + 1e-8)
    pg1 = -adv * ratio
    pg2 = -adv * jnp.clip(ratio, 1.0 - clip_epsilon, 1.0 + clip_epsilon)
    pg_loss = jnp.mean(jnp.maximum(pg1, pg2))
    if clip_value:
        v_unc = (values - returns) ** 2
        v_clipped = values + jnp.clip(new_values - values,
                                      -clip_epsilon, clip_epsilon)
        v_loss = 0.5 * jnp.mean(jnp.maximum(v_unc, (v_clipped - returns) ** 2))
    else:
        v_loss = 0.5 * jnp.mean((values - returns) ** 2)
    loss = pg_loss + value_coef * v_loss - entropy_coef * jnp.mean(new_entropies)
    return loss, old_approx_kl, approx_kl, frac_clipped


if __name__ == "__main__":
    # ClipPPOLoss has no learnable parameters; only hyperparameters.
    key = jax.random.PRNGKey(0)

    def make_inputs(k, n):
        ks = jax.random.split(k, 7)
        logprobs = -jnp.abs(jax.random.normal(ks[0], (n,), jnp.float32))
        new_logprobs = logprobs + 0.1 * jax.random.normal(ks[1], (n,), jnp.float32)
        values = jax.random.normal(ks[2], (n,), jnp.float32)
        new_values = values + 0.1 * jax.random.normal(ks[3], (n,), jnp.float32)
        advantages = jax.random.normal(ks[4], (n,), jnp.float32)
        returns = jax.random.normal(ks[5], (n,), jnp.float32)
        new_entropies = jnp.abs(jax.random.normal(ks[6], (n,), jnp.float32))
        return (logprobs, values, advantages, returns, new_logprobs,
                new_entropies, new_values)

    configs = [
        # (N, clip_value, norm_adv)
        (1024, False, True),        # small minibatch (8 envs x 128 steps), defaults
        (1024, True, False),        # value clipping on, no advantage normalisation
        (128 * 4104, False, True),  # multi-tile path + hostile partial last tile
    ]

    k = key
    for n, cv, na in configs:
        k, sub = jax.random.split(k)
        inp = make_inputs(sub, n)
        loss, stats = clip_ppo_loss(*inp, clip_epsilon=0.2, clip_value=cv,
                                    value_coef=0.5, entropy_coef=0.01,
                                    norm_adv=na)
        jax.block_until_ready(loss)

        ref_loss, ref_okl, ref_kl, ref_frac = _reference(
            *inp, clip_epsilon=0.2, clip_value=cv, value_coef=0.5,
            entropy_coef=0.01, norm_adv=na)

        assert jnp.allclose(loss, ref_loss, rtol=1e-4, atol=1e-5), (n, cv, na)
        assert jnp.allclose(stats["old_approx_kl"], ref_okl,
                            rtol=1e-4, atol=1e-5), (n, cv, na)
        assert jnp.allclose(stats["approx_kl"], ref_kl,
                            rtol=1e-4, atol=1e-5), (n, cv, na)
        assert jnp.allclose(stats["fraction_clipped"], ref_frac,
                            rtol=1e-4, atol=1e-5), (n, cv, na)

    print("KERNEL_OK")
</pallas_src>

<mosaic_0001>
module attributes {stable_mosaic.version = 11 : i64} {
  func.func @_ppo_loss_kernel(%arg0: i32, %arg1: i32, %arg2: memref<2xf32, #tpu.memory_space<smem>>, %arg3: memref<8x128xf32, #tpu.memory_space<vmem>>, %arg4: memref<8x128xf32, #tpu.memory_space<vmem>>, %arg5: memref<8x128xf32, #tpu.memory_space<vmem>>, %arg6: memref<8x128xf32, #tpu.memory_space<vmem>>, %arg7: memref<8x128xf32, #tpu.memory_space<vmem>>, %arg8: memref<8x128xf32, #tpu.memory_space<vmem>>, %arg9: memref<1x6x8x128xf32, #tpu.memory_space<vmem>>) attributes {dimension_semantics = [#tpu.dimension_semantics<parallel>, #tpu.dimension_semantics<arbitrary>], iteration_bounds = array<i64: 1, 1>, scalar_prefetch = 0 : i64, scratch_operands = 0 : i64, tpu.core_type = #tpu.core_type<tc>, window_params = [{transform_indices = @transform_0, window_bounds = array<i64: 2>}, {transform_indices = @transform_1, window_bounds = array<i64: 8, 128>}, {transform_indices = @transform_2, window_bounds = array<i64: 8, 128>}, {transform_indices = @transform_3, window_bounds = array<i64: 8, 128>}, {transform_indices = @transform_4, window_bounds = array<i64: 8, 128>}, {transform_indices = @transform_5, window_bounds = array<i64: 8, 128>}, {transform_indices = @transform_6, window_bounds = array<i64: 8, 128>}, {transform_indices = @transform_7, window_bounds = array<i64: 1, 6, 8, 128>}]} {
    %c0_i32 = arith.constant 0 : i32
    %0 = arith.cmpi eq, %arg1, %c0_i32 : i32
    %1 = arith.extui %0 : i1 to i32
    %c0_i32_0 = arith.constant 0 : i32
    %2 = arith.cmpi ne, %1, %c0_i32_0 : i32
    scf.if %2 {
      %cst_69 = arith.constant 0.000000e+00 : f32
      %88 = vector.broadcast %cst_69 : f32 to vector<6x8x128xf32>
      %c0_70 = arith.constant 0 : index
      %c0_71 = arith.constant 0 : index
      %c0_72 = arith.constant 0 : index
      %c0_73 = arith.constant 0 : index
      %89 = vector.load %arg9[%c0_70, %c0_71, %c0_72, %c0_73] : memref<1x6x8x128xf32, #tpu.memory_space<vmem>>, vector<1x6x8x128xf32>
      %90 = vector.shape_cast %89 : vector<1x6x8x128xf32> to vector<6x8x128xf32>
      %91 = vector.shape_cast %88 : vector<6x8x128xf32> to vector<1x6x8x128xf32>
      tpu.vector_store %arg9[%c0_70, %c0_71, %c0_72, %c0_73], %91 {strides = array<i32>} : memref<1x6x8x128xf32, #tpu.memory_space<vmem>>, vector<1x6x8x128xf32>,
    } else {
    }
    %c0 = arith.constant 0 : index
    %c0_1 = arith.constant 0 : index
    %3 = vector.load %arg7[%c0, %c0_1] : memref<8x128xf32, #tpu.memory_space<vmem>>, vector<8x128xf32>
    %c0_2 = arith.constant 0 : index
    %c0_3 = arith.constant 0 : index
    %4 = vector.load %arg3[%c0_2, %c0_3] : memref<8x128xf32, #tpu.memory_space<vmem>>, vector<8x128xf32>
    %5 = arith.subf %3, %4 : vector<8x128xf32>
    %6 = math.exp %5 : vector<8x128xf32>
    %c0_4 = arith.constant 0 : index
    %c0_5 = arith.constant 0 : index
    %c0_6 = arith.constant 0 : index
    %c0_7 = arith.constant 0 : index
    %7 = vector.load %arg9[%c0_4, %c0_5, %c0_6, %c0_7] : memref<1x6x8x128xf32, #tpu.memory_space<vmem>>, vector<1x1x8x128xf32>
    %8 = vector.shape_cast %7 : vector<1x1x8x128xf32> to vector<8x128xf32>
    %9 = vector.shape_cast %5 : vector<8x128xf32> to vector<1x8x128xf32>
    %cst = arith.constant dense<0.000000e+00> : vector<8x128xf32>
    %10 = vector.multi_reduction <add>, %9, %cst [0] : vector<1x8x128xf32> to vector<8x128xf32>
    %11 = arith.addf %8, %10 : vector<8x128xf32>
    %c0_8 = arith.constant 0 : index
    %c0_9 = arith.constant 0 : index
    %c0_10 = arith.constant 0 : index
    %c0_11 = arith.constant 0 : index
    %12 = vector.load %arg9[%c0_8, %c0_9, %c0_10, %c0_11] : memref<1x6x8x128xf32, #tpu.memory_space<vmem>>, vector<1x1x8x128xf32>
    %13 = vector.shape_cast %12 : vector<1x1x8x128xf32> to vector<8x128xf32>
    %14 = vector.shape_cast %11 : vector<8x128xf32> to vector<1x1x8x128xf32>
    tpu.vector_store %arg9[%c0_8, %c0_9, %c0_10, %c0_11], %14 {strides = array<i32>} : memref<1x6x8x128xf32, #tpu.memory_space<vmem>>, vector<1x1x8x128xf32>,
    %cst_12 = arith.constant 1.000000e+00 : f32
    %15 = vector.broadcast %cst_12 : f32 to vector<8x128xf32>
    %16 = arith.subf %6, %15 : vector<8x128xf32>
    %17 = arith.subf %16, %5 : vector<8x128xf32>
    %c0_13 = arith.constant 0 : index
    %c1 = arith.constant 1 : index
    %c0_14 = arith.constant 0 : index
    %c0_15 = arith.constant 0 : index
    %18 = vector.load %arg9[%c0_13, %c1, %c0_14, %c0_15] : memref<1x6x8x128xf32, #tpu.memory_space<vmem>>, vector<1x1x8x128xf32>
    %19 = vector.shape_cast %18 : vector<1x1x8x128xf32> to vector<8x128xf32>
    %20 = vector.shape_cast %17 : vector<8x128xf32> to vector<1x8x128xf32>
    %cst_16 = arith.constant dense<0.000000e+00> : vector<8x128xf32>
    %21 = vector.multi_reduction <add>, %20, %cst_16 [0] : vector<1x8x128xf32> to vector<8x128xf32>
    %22 = arith.addf %19, %21 : vector<8x128xf32>
    %c0_17 = arith.constant 0 : index
    %c1_18 = arith.constant 1 : index
    %c0_19 = arith.constant 0 : index
    %c0_20 = arith.constant 0 : index
    %23 = vector.load %arg9[%c0_17, %c1_18, %c0_19, %c0_20] : memref<1x6x8x128xf32, #tpu.memory_space<vmem>>, vector<1x1x8x128xf32>
    %24 = vector.shape_cast %23 : vector<1x1x8x128xf32> to vector<8x128xf32>
    %25 = vector.shape_cast %22 : vector<8x128xf32> to vector<1x1x8x128xf32>
    tpu.vector_store %arg9[%c0_17, %c1_18, %c0_19, %c0_20], %25 {strides = array<i32>} : memref<1x6x8x128xf32, #tpu.memory_space<vmem>>, vector<1x1x8x128xf32>,
    %cst_21 = arith.constant 1.000000e+00 : f32
    %26 = vector.broadcast %cst_21 : f32 to vector<8x128xf32>
    %27 = arith.subf %6, %26 : vector<8x128xf32>
    %28 = math.absf %27 : vector<8x128xf32>
    %cst_22 = arith.constant 2.000000e-01 : f32
    %29 = vector.broadcast %cst_22 : f32 to vector<8x128xf32>
    %30 = arith.cmpf ogt, %28, %29 : vector<8x128xf32>
    %31 = arith.extui %30 : vector<8x128xi1> to vector<8x128xi32>
    %32 = arith.sitofp %31 : vector<8x128xi32> to vector<8x128xf32>
    %c0_23 = arith.constant 0 : index
    %c2 = arith.constant 2 : index
    %c0_24 = arith.constant 0 : index
    %c0_25 = arith.constant 0 : index
    %33 = vector.load %arg9[%c0_23, %c2, %c0_24, %c0_25] : memref<1x6x8x128xf32, #tpu.memory_space<vmem>>, vector<1x1x8x128xf32>
    %34 = vector.shape_cast %33 : vector<1x1x8x128xf32> to vector<8x128xf32>
    %35 = vector.shape_cast %32 : vector<8x128xf32> to vector<1x8x128xf32>
    %cst_26 = arith.constant dense<0.000000e+00> : vector<8x128xf32>
    %36 = vector.multi_reduction <add>, %35, %cst_26 [0] : vector<1x8x128xf32> to vector<8x128xf32>
    %37 = arith.addf %34, %36 : vector<8x128xf32>
    %c0_27 = arith.constant 0 : index
    %c2_28 = arith.constant 2 : index
    %c0_29 = arith.constant 0 : index
    %c0_30 = arith.constant 0 : index
    %38 = vector.load %arg9[%c0_27, %c2_28, %c0_29, %c0_30] : memref<1x6x8x128xf32, #tpu.memory_space<vmem>>, vector<1x1x8x128xf32>
    %39 = vector.shape_cast %38 : vector<1x1x8x128xf32> to vector<8x128xf32>
    %40 = vector.shape_cast %37 : vector<8x128xf32> to vector<1x1x8x128xf32>
    tpu.vector_store %arg9[%c0_27, %c2_28, %c0_29, %c0_30], %40 {strides = array<i32>} : memref<1x6x8x128xf32, #tpu.memory_space<vmem>>, vector<1x1x8x128xf32>,
    %c0_31 = arith.constant 0 : index
    %c0_32 = arith.constant 0 : index
    %41 = vector.load %arg5[%c0_31, %c0_32] : memref<8x128xf32, #tpu.memory_space<vmem>>, vector<8x128xf32>
    %c0_33 = arith.constant 0 : index
    %42 = memref.load %arg2[%c0_33] : memref<2xf32, #tpu.memory_space<smem>>
    %43 = vector.broadcast %42 : f32 to vector<8x128xf32>
    %44 = arith.subf %41, %43 : vector<8x128xf32>
    %c1_34 = arith.constant 1 : index
    %45 = memref.load %arg2[%c1_34] : memref<2xf32, #tpu.memory_space<smem>>
    %46 = vector.broadcast %45 : f32 to vector<8x128xf32>
    %47 = arith.mulf %44, %46 : vector<8x128xf32>
    %cst_35 = arith.constant 0.000000e+00 : f32
    %48 = vector.broadcast %cst_35 : f32 to vector<8x128xf32>
    %49 = arith.subf %48, %47 : vector<8x128xf32>
    %50 = arith.mulf %49, %6 : vector<8x128xf32>
    %cst_36 = arith.constant 0.000000e+00 : f32
    %51 = vector.broadcast %cst_36 : f32 to vector<8x128xf32>
    %52 = arith.subf %51, %47 : vector<8x128xf32>
    %cst_37 = arith.constant 8.000000e-01 : f32
    %cst_38 = arith.constant 1.200000e+00 : f32
    %53 = vector.broadcast %cst_37 : f32 to vector<8x128xf32>
    %54 = arith.maximumf %53, %6 : vector<8x128xf32>
    %55 = vector.broadcast %cst_38 : f32 to vector<8x128xf32>
    %56 = arith.minimumf %55, %54 : vector<8x128xf32>
    %57 = arith.mulf %52, %56 : vector<8x128xf32>
    %58 = arith.maximumf %50, %57 : vector<8x128xf32>
    %c0_39 = arith.constant 0 : index
    %c3 = arith.constant 3 : index
    %c0_40 = arith.constant 0 : index
    %c0_41 = arith.constant 0 : index
    %59 = vector.load %arg9[%c0_39, %c3, %c0_40, %c0_41] : memref<1x6x8x128xf32, #tpu.memory_space<vmem>>, vector<1x1x8x128xf32>
    %60 = vector.shape_cast %59 : vector<1x1x8x128xf32> to vector<8x128xf32>
    %61 = vector.shape_cast %58 : vector<8x128xf32> to vector<1x8x128xf32>
    %cst_42 = arith.constant dense<0.000000e+00> : vector<8x128xf32>
    %62 = vector.multi_reduction <add>, %61, %cst_42 [0] : vector<1x8x128xf32> to vector<8x128xf32>
    %63 = arith.addf %60, %62 : vector<8x128xf32>
    %c0_43 = arith.constant 0 : index
    %c3_44 = arith.constant 3 : index
    %c0_45 = arith.constant 0 : index
    %c0_46 = arith.constant 0 : index
    %64 = vector.load %arg9[%c0_43, %c3_44, %c0_45, %c0_46] : memref<1x6x8x128xf32, #tpu.memory_space<vmem>>, vector<1x1x8x128xf32>
    %65 = vector.shape_cast %64 : vector<1x1x8x128xf32> to vector<8x128xf32>
    %66 = vector.shape_cast %63 : vector<8x128xf32> to vector<1x1x8x128xf32>
    tpu.vector_store %arg9[%c0_43, %c3_44, %c0_45, %c0_46], %66 {strides = array<i32>} : memref<1x6x8x128xf32, #tpu.memory_space<vmem>>, vector<1x1x8x128xf32>,
    %c0_47 = arith.constant 0 : index
    %c0_48 = arith.constant 0 : index
    %67 = vector.load %arg4[%c0_47, %c0_48] : memref<8x128xf32, #tpu.memory_space<vmem>>, vector<8x128xf32>
    %c0_49 = arith.constant 0 : index
    %c0_50 = arith.constant 0 : index
    %68 = vector.load %arg6[%c0_49, %c0_50] : memref<8x128xf32, #tpu.memory_space<vmem>>, vector<8x128xf32>
    %69 = arith.subf %67, %68 : vector<8x128xf32>
    %70 = arith.mulf %69, %69 : vector<8x128xf32>
    %c0_51 = arith.constant 0 : index
    %c4 = arith.constant 4 : index
    %c0_52 = arith.constant 0 : index
    %c0_53 = arith.constant 0 : index
    %71 = vector.load %arg9[%c0_51, %c4, %c0_52, %c0_53] : memref<1x6x8x128xf32, #tpu.memory_space<vmem>>, vector<1x1x8x128xf32>
    %72 = vector.shape_cast %71 : vector<1x1x8x128xf32> to vector<8x128xf32>
    %73 = vector.shape_cast %70 : vector<8x128xf32> to vector<1x8x128xf32>
    %cst_54 = arith.constant dense<0.000000e+00> : vector<8x128xf32>
    %74 = vector.multi_reduction <add>, %73, %cst_54 [0] : vector<1x8x128xf32> to vector<8x128xf32>
    %75 = arith.addf %72, %74 : vector<8x128xf32>
    %c0_55 = arith.constant 0 : index
    %c4_56 = arith.constant 4 : index
    %c0_57 = arith.constant 0 : index
    %c0_58 = arith.constant 0 : index
    %76 = vector.load %arg9[%c0_55, %c4_56, %c0_57, %c0_58] : memref<1x6x8x128xf32, #tpu.memory_space<vmem>>, vector<1x1x8x128xf32>
    %77 = vector.shape_cast %76 : vector<1x1x8x128xf32> to vector<8x128xf32>
    %78 = vector.shape_cast %75 : vector<8x128xf32> to vector<1x1x8x128xf32>
    tpu.vector_store %arg9[%c0_55, %c4_56, %c0_57, %c0_58], %78 {strides = array<i32>} : memref<1x6x8x128xf32, #tpu.memory_space<vmem>>, vector<1x1x8x128xf32>,
    %c0_59 = arith.constant 0 : index
    %c0_60 = arith.constant 0 : index
    %79 = vector.load %arg8[%c0_59, %c0_60] : memref<8x128xf32, #tpu.memory_space<vmem>>, vector<8x128xf32>
    %c0_61 = arith.constant 0 : index
    %c5 = arith.constant 5 : index
    %c0_62 = arith.constant 0 : index
    %c0_63 = arith.constant 0 : index
    %80 = vector.load %arg9[%c0_61, %c5, %c0_62, %c0_63] : memref<1x6x8x128xf32, #tpu.memory_space<vmem>>, vector<1x1x8x128xf32>
    %81 = vector.shape_cast %80 : vector<1x1x8x128xf32> to vector<8x128xf32>
    %82 = vector.shape_cast %79 : vector<8x128xf32> to vector<1x8x128xf32>
    %cst_64 = arith.constant dense<0.000000e+00> : vector<8x128xf32>
    %83 = vector.multi_reduction <add>, %82, %cst_64 [0] : vector<1x8x128xf32> to vector<8x128xf32>
    %84 = arith.addf %81, %83 : vector<8x128xf32>
    %c0_65 = arith.constant 0 : index
    %c5_66 = arith.constant 5 : index
    %c0_67 = arith.constant 0 : index
    %c0_68 = arith.constant 0 : index
    %85 = vector.load %arg9[%c0_65, %c5_66, %c0_67, %c0_68] : memref<1x6x8x128xf32, #tpu.memory_space<vmem>>, vector<1x1x8x128xf32>
    %86 = vector.shape_cast %85 : vector<1x1x8x128xf32> to vector<8x128xf32>
    %87 = vector.shape_cast %84 : vector<8x128xf32> to vector<1x1x8x128xf32>
    tpu.vector_store %arg9[%c0_65, %c5_66, %c0_67, %c0_68], %87 {strides = array<i32>} : memref<1x6x8x128xf32, #tpu.memory_space<vmem>>, vector<1x1x8x128xf32>,
    return
  }
  func.func @transform_0(%arg0: i32, %arg1: i32) -> i32 {
    %c0_i32 = arith.constant 0 : i32
    %c0_i32_0 = arith.constant 0 : i32
    return %c0_i32 : i32
  }
  func.func @transform_1(%arg0: i32, %arg1: i32) -> (i32, i32) {
    %c1_i32 = arith.constant 1 : i32
    %0 = arith.muli %arg0, %c1_i32 : i32
    %1 = arith.addi %0, %arg1 : i32
    %c0_i32 = arith.constant 0 : i32
    %2 = arith.minsi %1, %c0_i32 : i32
    %c0_i32_0 = arith.constant 0 : i32
    %c0_i32_1 = arith.constant 0 : i32
    return %2, %c0_i32_0 : i32, i32
  }
  func.func @transform_2(%arg0: i32, %arg1: i32) -> (i32, i32) {
    %c1_i32 = arith.constant 1 : i32
    %0 = arith.muli %arg0, %c1_i32 : i32
    %1 = arith.addi %0, %arg1 : i32
    %c0_i32 = arith.constant 0 : i32
    %2 = arith.minsi %1, %c0_i32 : i32
    %c0_i32_0 = arith.constant 0 : i32
    %c0_i32_1 = arith.constant 0 : i32
    return %2, %c0_i32_0 : i32, i32
  }
  func.func @transform_3(%arg0: i32, %arg1: i32) -> (i32, i32) {
    %c1_i32 = arith.constant 1 : i32
    %0 = arith.muli %arg0, %c1_i32 : i32
    %1 = arith.addi %0, %arg1 : i32
    %c0_i32 = arith.constant 0 : i32
    %2 = arith.minsi %1, %c0_i32 : i32
    %c0_i32_0 = arith.constant 0 : i32
    %c0_i32_1 = arith.constant 0 : i32
    return %2, %c0_i32_0 : i32, i32
  }
  func.func @transform_4(%arg0: i32, %arg1: i32) -> (i32, i32) {
    %c1_i32 = arith.constant 1 : i32
    %0 = arith.muli %arg0, %c1_i32 : i32
    %1 = arith.addi %0, %arg1 : i32
    %c0_i32 = arith.constant 0 : i32
    %2 = arith.minsi %1, %c0_i32 : i32
    %c0_i32_0 = arith.constant 0 : i32
    %c0_i32_1 = arith.constant 0 : i32
    return %2, %c0_i32_0 : i32, i32
  }
  func.func @transform_5(%arg0: i32, %arg1: i32) -> (i32, i32) {
    %c1_i32 = arith.constant 1 : i32
    %0 = arith.muli %arg0, %c1_i32 : i32
    %1 = arith.addi %0, %arg1 : i32
    %c0_i32 = arith.constant 0 : i32
    %2 = arith.minsi %1, %c0_i32 : i32
    %c0_i32_0 = arith.constant 0 : i32
    %c0_i32_1 = arith.constant 0 : i32
    return %2, %c0_i32_0 : i32, i32
  }
  func.func @transform_6(%arg0: i32, %arg1: i32) -> (i32, i32) {
    %c1_i32 = arith.constant 1 : i32
    %0 = arith.muli %arg0, %c1_i32 : i32
    %1 = arith.addi %0, %arg1 : i32
    %c0_i32 = arith.constant 0 : i32
    %2 = arith.minsi %1, %c0_i32 : i32
    %c0_i32_0 = arith.constant 0 : i32
    %c0_i32_1 = arith.constant 0 : i32
    return %2, %c0_i32_0 : i32, i32
  }
  func.func @transform_7(%arg0: i32, %arg1: i32) -> (i32, i32, i32, i32) {
    %c0_i32 = arith.constant 0 : i32
    %c0_i32_0 = arith.constant 0 : i32
    %c0_i32_1 = arith.constant 0 : i32
    %c0_i32_2 = arith.constant 0 : i32
    return %arg0, %c0_i32, %c0_i32_0, %c0_i32_1 : i32, i32, i32, i32
  }
}

</mosaic_0001>

<bundles_post_ra>
// kernel: tpu_custom_call.1
= control target key start
LH: loop header
LB: loop body
LE: loop exit
PB: predicated region body
PF: predicated region fallthrough
CT: control target
= control target key end

     0   :  { %12 = vsyncpa [#allocation5], 0  ;;  %s550_s0 = inlined_call_operand.hbm [shape: f32[2], index: 0, kind: input, shape index: {}]   ;;  %s551_s1 = inlined_call_operand.hbm [shape: f32[8,128], index: 1, kind: input, shape index: {}]   ;;  %s552_s2 = inlined_call_operand.hbm [shape: f32[8,128], index: 2, kind: input, shape index: {}]   ;;  %s553_s3 = inlined_call_operand.vmem [shape: f32[8,128], index: 3, kind: input, shape index: {}]   ;;  %s554_s4 = inlined_call_operand.hbm [shape: f32[8,128], index: 4, kind: input, shape index: {}]   ;;  %s555_s5 = inlined_call_operand.vmem [shape: f32[8,128], index: 5, kind: input, shape index: {}]   ;;  %s556_s6 = inlined_call_operand.hbm [shape: f32[8,128], index: 6, kind: input, shape index: {}]   ;;  %s557_s7 = inlined_call_operand.hbm [shape: f32[1,6,8,128], index: 7, kind: output, shape index: {}]  }
   0x1   :  { %13 = vsyncpa [#allocation3], 0 }
   0x2   :  { %14 = vsyncpa [#allocation8], 0 }
   0x3   :  { %15 = vsyncpa [#allocation11], 0 }
   0x4   :  { %16 = vsyncpa [#allocation4], 0  ;;  %s423_s24 = smov [#allocation7]   ;;  %s424_s26 = smov [#allocation6]  }
   0x5   :  { %s51_s25 = sshll.u32 %s423_s24, 4  ;;  %s36_s27 = sshll.u32 %s424_s26, 4  ;;  %s52_s25 = int_to_ptr.vmem [resolvable:$true] %s51_s25  ;;  %s37_s27 = int_to_ptr.vmem [resolvable:$true] %s36_s27 }
   0x6   :  { %s293_s30 = scalar_lea.hbm %s552_s2, 128 }
   0x7   :  { %p294_p0 = scmp.ne.s32.totalorder %s552_s2, %s293_s30  ;;  %p297_p1 = scmp.lt.u32.totalorder %s293_s30, %s552_s2 }
   0x9   :  { %p299_p2 = pnand %p297_p1, %p294_p0 }
   0xb   :  { %302 = shalt.err (!%p299_p2)
}
   0xc   :  { %s303_s12 = scalar_lea.vmem %s52_s25, 128  ;;  %p308_p4 = scmp.lt.s32.totalorder %s52_s25, %s52_s25 }
   0xd   :  { %p304_p3 = scmp.ne.s32.totalorder %s52_s25, %s303_s12  ;;  %p309_p5 = scmp.lt.s32.totalorder %s303_s12, %s303_s12 }
   0xf   :  { %p310_p6 = por %p309_p5, %p308_p4 }
  0x11   :  { %p311_p7 = pnand %p310_p6, %p304_p3 }
  0x13   :  { %314 = shalt.err (!%p311_p7)
}
  0x14   :  { %54 = dma.hbm_to_vmem [thread:$0]  %s552_s2, 128, %s52_s25, [#allocation8]  }
  0x15   :  { %s315_s17 = scalar_lea.hbm %s550_s0, 16 }
  0x16   :  { %p316_p8 = scmp.ne.s32.totalorder %s550_s0, %s315_s17  ;;  %p319_p9 = scmp.lt.u32.totalorder %s315_s17, %s550_s0 }
  0x18   :  { %p321_p10 = pnand %p319_p9, %p316_p8 }
  0x1a   :  { %324 = shalt.err (!%p321_p10)
}
  0x1b   :  { %s425_s22 = smov [#allocation2]   ;;  %s325_s26 = scalar_lea.hbm %s551_s1, 128 }
  0x1c   :  { %24 = dma.hbm_to_smem %s550_s0, 16, %s425_s22, [#allocation5]  }
  0x1d   :  { %p326_p11 = scmp.ne.s32.totalorder %s551_s1, %s325_s26  ;;  %p329_p12 = scmp.lt.u32.totalorder %s325_s26, %s551_s1 }
  0x1f   :  { %p331_p13 = pnand %p329_p12, %p326_p11 }
  0x21   :  { %334 = shalt.err (!%p331_p13)
}
  0x22   :  { %s335_s9 = scalar_lea.vmem %s37_s27, 128  ;;  %p340_p1 = scmp.lt.s32.totalorder %s37_s27, %s37_s27 }
  0x23   :  { %p336_p0 = scmp.ne.s32.totalorder %s37_s27, %s335_s9  ;;  %p341_p2 = scmp.lt.s32.totalorder %s335_s9, %s335_s9 }
  0x25   :  { %p342_p3 = por %p341_p2, %p340_p1 }
  0x27   :  { %p343_p4 = pnand %p342_p3, %p336_p0 }
  0x29   :  { %346 = shalt.err (!%p343_p4)
}
  0x2a   :  { %39 = dma.hbm_to_vmem [thread:$0]  %s551_s1, 128, %s37_s27, [#allocation3]  }
  0x2b   :  { %s426_s11 = smov [#allocation9]   ;;  %s427_s13 = smov [#allocation10]  }
  0x2c   :  { %s78_s12 = sshll.u32 %s426_s11, 4  ;;  %s105_s14 = sshll.u32 %s427_s13, 4  ;;  %s79_s12 = int_to_ptr.vmem [resolvable:$true] %s78_s12  ;;  %s106_s14 = int_to_ptr.vmem [resolvable:$true] %s105_s14 }
  0x2d   :  { %s347_s17 = scalar_lea.hbm %s554_s4, 128 }
  0x2e   :  { %p348_p5 = scmp.ne.s32.totalorder %s554_s4, %s347_s17  ;;  %p351_p6 = scmp.lt.u32.totalorder %s347_s17, %s554_s4 }
  0x30   :  { %p353_p7 = pnand %p351_p6, %p348_p5 }
  0x32   :  { %356 = shalt.err (!%p353_p7)
}
  0x33   :  { %s357_s1 = scalar_lea.vmem %s79_s12, 128  ;;  %p362_p9 = scmp.lt.s32.totalorder %s79_s12, %s79_s12 }
  0x34   :  { %p358_p8 = scmp.ne.s32.totalorder %s79_s12, %s357_s1  ;;  %p363_p10 = scmp.lt.s32.totalorder %s357_s1, %s357_s1 }
  0x36   :  { %p364_p11 = por %p363_p10, %p362_p9 }
  0x38   :  { %p365_p12 = pnand %p364_p11, %p358_p8 }
  0x3a   :  { %368 = shalt.err (!%p365_p12)
}
  0x3b   :  { %81 = dma.hbm_to_vmem [thread:$0]  %s554_s4, 128, %s79_s12, [#allocation8]  }
  0x3c   :  { %s369_s2 = scalar_lea.hbm %s556_s6, 128 }
  0x3d   :  { %p370_p13 = scmp.ne.s32.totalorder %s556_s6, %s369_s2  ;;  %p373_p0 = scmp.lt.u32.totalorder %s369_s2, %s556_s6 }
  0x3f   :  { %p375_p1 = pnand %p373_p0, %p370_p13 }
  0x41   :  { %378 = shalt.err (!%p375_p1)
}
  0x42   :  { %s379_s30 = scalar_lea.vmem %s106_s14, 128  ;;  %p384_p3 = scmp.lt.s32.totalorder %s106_s14, %s106_s14 }
  0x43   :  { %p380_p2 = scmp.ne.s32.totalorder %s106_s14, %s379_s30  ;;  %p385_p4 = scmp.lt.s32.totalorder %s379_s30, %s379_s30 }
  0x45   :  { %p386_p5 = por %p385_p4, %p384_p3 }
  0x47   :  { %p387_p6 = pnand %p386_p5, %p380_p2 }
  0x49   :  { %390 = shalt.err (!%p387_p6)
}
  0x4a   :  { %108 = dma.hbm_to_vmem [thread:$0]  %s556_s6, 128, %s106_s14, [#allocation11]  }
  0x4b   :  { %413 = dma.done.wait [#allocation5], 16  }
  0x4c   :  { %414 = vsyncadd [#allocation5], 4294967280 }
  0x4d   :  { %415 = dma.done.wait [#allocation3], 128  }
  0x4e   :  { %416 = vsyncadd [#allocation3], 4294967168 }
  0x4f   :  { %417 = dma.done.wait [#allocation8], 256  }
  0x50   :  { %418 = vsyncadd [#allocation8], 4294967040 }
  0x51   :  { %419 = dma.done.wait [#allocation11], 128  }
  0x52   :  { %420 = vsyncadd [#allocation11], 4294967168 }
  0x53   :  { %124 = sfence }
  0x54   :  { %v181_v0 = vld [vmem:[%s555_s5] sm:$0xff]  ;;  %v182_v1 = vld [vmem:[#allocation6] sm:$0xff]  ;;  %s207_s10 = sld [smem:[#allocation2]]  ;;  %s281_s11 = sld [smem:[#allocation2 + $0x1]]  ;;  %v224_v3 = vld [vmem:[#allocation7] sm:$0xff]  ;;  %v428_v23 = vmov 0.0  }
  0x55   :  { %v183_v2 = vsub.f32 %v181_v0, %v182_v1  ;;  %v225_v4 = vld [vmem:[#allocation9] sm:$0xff]  ;;  %v233_v5 = vld [vmem:[#allocation10] sm:$0xff] }
  0x56   :  { %v226_v6 = vsub.f32 %v224_v3, %v225_v4  ;;  %v206_v8 = vld [vmem:[%s553_s3] sm:$0xff]  ;;  %238 = vst [vmem:[#allocation12 + $0x28] sm:$0xff] %v233_v5  ;;  %s429_s3 = smov [#allocation12]  }
  0x57   :  { %v184_v7 = vmul.f32 1.442695, %v183_v2  ;;  %189 = vst [vmem:[#allocation12] sm:$0xff] %v183_v2  ;;  %s244_s5 = sshll.u32 %s429_s3, 4  ;;  %s245_s5 = int_to_ptr.vmem [resolvable:$true] %s244_s5 }
  0x58   :  { %v227_v9 = vmul.f32 %v226_v6, %v226_v6  ;;  %s391_s13 = scalar_lea.vmem %s245_s5, 768  ;;  %p396_p8 = scmp.lt.s32.totalorder %s245_s5, %s245_s5 }
  0x59   :  { %291 = vpow2.f32 %v184_v7  ;;  %p392_p7 = scmp.ne.s32.totalorder %s245_s5, %s391_s13  ;;  %p397_p9 = scmp.lt.s32.totalorder %s391_s13, %s391_s13 }
  0x5a   :  { %v208_v10 = vstv %s207_s10  ;;  %v211_v12 = vstv %s281_s11  ;;  %232 = vst [vmem:[#allocation12 + $0x20] sm:$0xff] %v227_v9 }
  0x5b   :  { %v209_v11 = vsub.f32 %v206_v8, %v208_v10  ;;  %p398_p10 = por %p397_p9, %p396_p8 }
  0x5d   :  { %v212_v13 = vmul.f32 %v211_v12, %v209_v11  ;;  %p399_p11 = pnand %p398_p10, %p392_p7 }
  0x5f   :  { %v213_v14 = vsub.f32 0.0, %v212_v13 }
  0x63   :  { %v292_v15 = vpop.eup %291 }
  0x64   :  { %v279_v16 = vadd.f32 -1.0, %v292_v15  ;;  %v215_v17 = vmax.f32 %v292_v15, 0.8  ;;  %v214_v20 = vmul.f32 %v292_v15, %v213_v14 }
  0x66   :  { %v191_v18 = vsub.f32 %v279_v16, %v183_v2  ;;  %v197_v19 = vand.u32 2147483647, %v279_v16  ;;  %v216_v21 = vmin.f32 %v215_v17, 1.2 }
  0x68   :  { %vm198_vm0 = vcmp.gt.f32.partialorder %v197_v19, 0.2  ;;  %v217_v22 = vmul.f32 %v216_v21, %v213_v14  ;;  %196 = vst [vmem:[#allocation12 + $0x8] sm:$0xff] %v191_v18 }
  0x69   :  { %v280_v24 = vsel %vm198_vm0, 1.0, %v428_v23 }
  0x6a   :  { %v218_v25 = vmax.f32 %v214_v20, %v217_v22  ;;  %205 = vst [vmem:[#allocation12 + $0x10] sm:$0xff] %v280_v24 }
  0x6c   :  { %223 = vst [vmem:[#allocation12 + $0x18] sm:$0xff] %v218_v25 }
  0x6d   :  { %402 = shalt.err (!%p399_p11)
}
  0x6e   :  { %s403_s16 = scalar_lea.hbm %s557_s7, 768 }
  0x6f   :  { %p404_p12 = scmp.ne.s32.totalorder %s557_s7, %s403_s16  ;;  %p407_p13 = scmp.lt.u32.totalorder %s403_s16, %s557_s7 }
  0x71   :  { %p409_p0 = pnand %p407_p13, %p404_p12 }
  0x73   :  { %412 = shalt.err (!%p409_p0)
}
  0x74   :  { %s430_s21 = smov 128   ;;  %s431_s1 = smov 8  }
  0x75   :  { %250 = dma.vmem_to_hbm [thread:$0]  %s245_s5, 768, %s557_s7, [#allocation4], %s430_s21, %s430_s21, %s431_s1  }
  0x76   :  { %421 = dma.done.wait [#allocation4], 768  }
  0x77   :  { %422 = vsyncadd [#allocation4], 4294966528 }
  0x78   :  { %254 = vsyncpa [#allocation3], 1 }
  0x79   :  { %255 = vsyncpa [#allocation8], 1 }
  0x7a   :  { %256 = vsyncpa [#allocation11], 1 }
  0x7b   :  { %257 = vsyncpa [#allocation4], 1 }
  0x7c   :  { %258 = vsyncpa [#allocation5], 1 }

</bundles_post_ra>
